<compile_context>
chip_gen: v7x
topology: tpu7x:2x2x1
jax: 0.10.0
libtpu: 0.0.40
codegen_flags: <defaults>
</compile_context>

<pallas_src>
import functools
import math

import jax
import jax.numpy as jnp
import numpy as np
from jax.experimental import pallas as pl
from jax.experimental.pallas import tpu as pltpu

_C1 = 0.01 ** 2  # SSIM constants (monodepth2 / flash3d SSIM module)
_C2 = 0.03 ** 2


def _round_up(x, m):
    return ((x + m - 1) // m) * m


def _vmem_limit_bytes():
    # Generation-aware scoped-VMEM limit: v7x has 64 MiB physical per TC,
    # v5e/v6e 128 MiB.  Review: 48 MiB limit on v7x, 64 MiB on v5e/v6e.
    try:
        phys = int(pltpu.get_tpu_info().vmem_capacity_bytes)
    except Exception:
        phys = 128 * 1024 * 1024
    return int(min(64 * 1024 * 1024, (phys * 3) // 4))


# ----------------------------------------------------------------------------
# Pallas kernels
# ----------------------------------------------------------------------------
def _recon_loss_kernel(mask_ref, x_ref, y_ref, mse_ref, ssim_ref,
                       acc_mse, acc_ssim, *, mse_type):
    """Photometric (L1/L2) + SSIM partial sums for one (par, frame, image-block).

    x_ref/y_ref: (H+2, tile_n*(W+2)) reflect-padded blocks; the lane axis packs
    (image, padded column) densely.  mask_ref: (1, tile_n*(W+2)) validity mask
    (real image AND real column) sliced by the same lane BlockSpec.
    acc_mse/acc_ssim: (H, tile_L-2) f32 VMEM scratch -- elementwise partial-sum
    accumulators; the cross-lane reduction happens once per frame at the last
    image-block.
    """
    nb = pl.program_id(2)

    @pl.when(nb == 0)
    def _init():
        acc_mse[...] = jnp.zeros_like(acc_mse)
        acc_ssim[...] = jnp.zeros_like(acc_ssim)

    # torch path sanitizes pred and target with nan_to_num(nan=0.0); fold it in.
    xp = jnp.nan_to_num(x_ref[...].astype(jnp.float32), nan=0.0)
    yp = jnp.nan_to_num(y_ref[...].astype(jnp.float32), nan=0.0)
    Hp, L = xp.shape
    H = Hp - 2
    L2 = L - 2

    # --- separable 3x3 pool, vertical pass (sublane-offset slices).  The same
    # 4 shifted operands are reused for all products (x^2, y^2, x*y). ----------
    x0, x1, x2 = xp[0:H, :], xp[1:H + 1, :], xp[2:H + 2, :]
    y0, y1, y2 = yp[0:H, :], yp[1:H + 1, :], yp[2:H + 2, :]
    vx = x0 + x1 + x2
    vy = y0 + y1 + y2
    vxx = x0 * x0 + x1 * x1 + x2 * x2
    vyy = y0 * y0 + y1 * y1 + y2 * y2
    vxy = x0 * y0 + x1 * y1 + x2 * y2

    # --- horizontal pass (lane-offset slices).  Windows never straddle an
    # image boundary because each image carries its own 1-px padded border; the
    # garbage positions (border columns / padded images) are masked out below.
    def hpool(v):
        return v[:, 0:L2] + v[:, 1:L2 + 1] + v[:, 2:L2 + 2]

    inv9 = 1.0 / 9.0
    mu_x = hpool(vx) * inv9
    mu_y = hpool(vy) * inv9
    sigma_x = hpool(vxx) * inv9 - mu_x * mu_x
    sigma_y = hpool(vyy) * inv9 - mu_y * mu_y
    sigma_xy = hpool(vxy) * inv9 - mu_x * mu_y

    ssim_n = (2.0 * mu_x * mu_y + _C1) * (2.0 * sigma_xy + _C2)
    ssim_d = (mu_x * mu_x + mu_y * mu_y + _C1) * (sigma_x + sigma_y + _C2)
    # EUP reciprocal instead of a full-precision divide (error << loss tol).
    ssim_map = jnp.clip(
        (1.0 - ssim_n * pl.reciprocal(ssim_d, approx=True)) * 0.5, 0.0, 1.0)

    # Photometric term on the centre crop (same valid lane window as the pool).
    diff = x1[:, 1:L2 + 1] - y1[:, 1:L2 + 1]
    if mse_type == "l1":
        pe = jnp.abs(diff)
    else:  # "l2"
        pe = diff * diff

    m = mask_ref[...][:, 0:L2]  # (1, L2) -> broadcast over H sublanes

    # Elementwise partial-sum accumulation (VPU); no per-block XLU reductions.
    acc_mse[...] = acc_mse[...] + pe * m
    acc_ssim[...] = acc_ssim[...] + ssim_map * m

    @pl.when(nb == pl.num_programs(2) - 1)
    def _finalize():
        mse_ref[...] = jnp.full(mse_ref.shape, jnp.sum(acc_mse[...]),
                                mse_ref.dtype)
        ssim_ref[...] = jnp.full(ssim_ref.shape, jnp.sum(acc_ssim[...]),
                                 ssim_ref.dtype)


def _gauss_reg_kernel(s_ref, o_ref, out_ref, acc_s, acc_sc, acc_o, acc_oc,
                      *, s_thresh, o_thresh):
    """Fused thresholded regularizers on one (row_tile, 128) lane-dense block.

    Partial sums are accumulated elementwise in VMEM scratch; the four scalar
    reductions are done once at the last row-block and written to the SMEM
    output: [sum(scale | scale>t_s), count, sum(off^2 | off^2>t_o^2), count].
    Zero padding never passes the strict '>' thresholds used here.
    """
    rb = pl.program_id(0)

    @pl.when(rb == 0)
    def _init():
        acc_s[...] = jnp.zeros_like(acc_s)
        acc_sc[...] = jnp.zeros_like(acc_sc)
        acc_o[...] = jnp.zeros_like(acc_o)
        acc_oc[...] = jnp.zeros_like(acc_oc)

    s = s_ref[...].astype(jnp.float32)
    o = o_ref[...].astype(jnp.float32)

    sm = (s > s_thresh).astype(jnp.float32)
    o2 = o * o
    om = (o2 > (o_thresh * o_thresh)).astype(jnp.float32)

    acc_s[...] = acc_s[...] + s * sm
    acc_sc[...] = acc_sc[...] + sm
    acc_o[...] = acc_o[...] + o2 * om
    acc_oc[...] = acc_oc[...] + om

    @pl.when(rb == pl.num_programs(0) - 1)
    def _finalize():
        out_ref[0, 0] = jnp.sum(acc_s[...])
        out_ref[0, 1] = jnp.sum(acc_sc[...])
        out_ref[0, 2] = jnp.sum(acc_o[...])
        out_ref[0, 3] = jnp.sum(acc_oc[...])


# ----------------------------------------------------------------------------
# Kernel wrappers
# ----------------------------------------------------------------------------
def recon_loss_terms_all_frames(preds, targets, mse_type):
    """preds/targets: length-F lists of (B, C, H, W).  Returns per-frame
    (mse_mean, ssim_mean) vectors of shape (F,) from one fused pallas_call."""
    num_frames = len(preds)
    B, C, H, W = preds[0].shape
    N = B * C
    Hp, Wp = H + 2, W + 2

    # Keep the backbone dtype through the DMA (bf16 stays bf16); upcast in-kernel.
    x = jnp.stack(preds, axis=0).reshape(num_frames, N, H, W)
    y = jnp.stack(targets, axis=0).reshape(num_frames, N, H, W)

    vmem_limit = _vmem_limit_bytes()
    # ~20 f32 map-sized live temporaries + 2 scratch accumulators + 2 inputs x 2
    # pipeline buffers per block -> cap the per-block (8,128)-TILED f32 map
    # footprint at ~vmem_limit/32 (=> ~1.5 MiB slabs on v7x, ~2 MiB on v5e/v6e).
    slab_cap = max(192 * 1024, vmem_limit // 32)
    row_bytes = _round_up(Hp, 8) * 4  # tiled f32 row footprint

    if row_bytes * _round_up(N * Wp, 128) <= slab_cap:
        tile_n, n_blocks, n_par = N, 1, 1
    else:
        # Lane-tiled path: the block's lane width tile_n*Wp must be a multiple
        # of 128; lane_mult*Wp == lcm(Wp, 128).
        lane_mult = 128 // math.gcd(Wp, 128)
        per_group = row_bytes * lane_mult * Wp
        tile_n = max(1, slab_cap // per_group) * lane_mult
        # TODO(synk): single images larger than the slab cap would additionally
        # need H-tiling; not required for flash3d crop sizes.
        n_blocks = -(-N // tile_n)
        n_par = 2 if n_blocks >= 2 else 1  # v7x 2-TC balance on the image axis
        n_blocks = _round_up(n_blocks, n_par)
    nbp = n_blocks // n_par
    n_pad = n_blocks * tile_n
    tile_L = tile_n * Wp

    if n_pad != N:
        padn = ((0, 0), (0, n_pad - N), (0, 0), (0, 0))
        x = jnp.pad(x, padn)  # padded images are masked out exactly in-kernel
        y = jnp.pad(y, padn)

    # One relayout copy: SSIM's ReflectionPad2d(1) fused with the lane-dense
    # transpose (F, Np, Hp, Wp) -> (F, Hp, Np*Wp), so the kernel's lane axis
    # carries Np*Wp (dense) instead of Wp alone.
    pr = ((0, 0), (0, 0), (1, 1), (1, 1))
    x = jnp.transpose(jnp.pad(x, pr, mode="reflect"), (0, 2, 1, 3))
    y = jnp.transpose(jnp.pad(y, pr, mode="reflect"), (0, 2, 1, 3))
    x = x.reshape(num_frames, Hp, n_pad * Wp)
    y = y.reshape(num_frames, Hp, n_pad * Wp)

    # Static validity mask over pooled-window start lanes: real image AND real
    # column.  Sliced per block by the same lane BlockSpec as x/y, so no integer
    # div/mod is needed inside the kernel and padded images contribute exactly 0.
    lane = np.arange(n_pad * Wp)
    valid = ((lane % Wp) < W) & ((lane // Wp) < N)
    mask = jnp.asarray(valid.astype(np.float32)).reshape(1, n_pad * Wp)

    mse_sums, ssim_sums = pl.pallas_call(
        functools.partial(_recon_loss_kernel, mse_type=mse_type),
        out_shape=(
            jax.ShapeDtypeStruct((n_par, num_frames, 8, 128), jnp.float32),
            jax.ShapeDtypeStruct((n_par, num_frames, 8, 128), jnp.float32),
        ),
        grid_spec=pltpu.PrefetchScalarGridSpec(
            num_scalar_prefetch=0,
            grid=(n_par, num_frames, nbp),
            in_specs=[
                pl.BlockSpec((1, tile_L),
                             lambda p, f, nb: (0, p * nbp + nb)),
                pl.BlockSpec((None, Hp, tile_L),
                             lambda p, f, nb: (f, 0, p * nbp + nb)),
                pl.BlockSpec((None, Hp, tile_L),
                             lambda p, f, nb: (f, 0, p * nbp + nb)),
            ],
            out_specs=(
                pl.BlockSpec((None, None, 8, 128),
                             lambda p, f, nb: (p, f, 0, 0)),
                pl.BlockSpec((None, None, 8, 128),
                             lambda p, f, nb: (p, f, 0, 0)),
            ),
            scratch_shapes=[pltpu.VMEM((H, tile_L - 2), jnp.float32),
                            pltpu.VMEM((H, tile_L - 2), jnp.float32)]),
        compiler_params=pltpu.CompilerParams(
            dimension_semantics=("parallel", "parallel", "arbitrary"),
            vmem_limit_bytes=vmem_limit),
    )(mask, x, y)

    denom = float(B * C * H * W)
    mse_means = jnp.sum(mse_sums[:, :, 0, 0], axis=0) / denom
    ssim_means = jnp.sum(ssim_sums[:, :, 0, 0], axis=0) / denom
    return mse_means, ssim_means


def _lane_slab(x, rows):
    """Flatten to a lane-dense (rows, 128) slab (keeps input dtype)."""
    flat = x.reshape(-1)
    pad = rows * 128 - flat.shape[0]
    if pad:
        flat = jnp.pad(flat, (0, pad))
    return flat.reshape(rows, 128)


def gauss_reg_losses(scaling, offset, scale_thresh, offset_thresh):
    """Fused flash3d regularizers.  Empty selection -> 0 (matches the torch
    flash3d path's explicit `else 0` branch)."""
    ROW_TILE = 512  # 512*128*4 B = 256 KiB per input per block
    rows = max(-(-int(scaling.size) // 128), -(-int(offset.size) // 128), 8)
    if rows > ROW_TILE:
        rows = _round_up(rows, ROW_TILE)
        row_tile = ROW_TILE
    else:
        rows = _round_up(rows, 8)
        row_tile = rows
    n_rb = rows // row_tile

    s2d = _lane_slab(scaling, rows)
    o2d = _lane_slab(offset, rows)

    sums = pl.pallas_call(
        functools.partial(_gauss_reg_kernel,
                          s_thresh=float(scale_thresh),
                          o_thresh=float(offset_thresh)),
        out_shape=jax.ShapeDtypeStruct((1, 4), jnp.float32),
        grid_spec=pltpu.PrefetchScalarGridSpec(
            num_scalar_prefetch=0,
            grid=(n_rb,),
            in_specs=[pl.BlockSpec((row_tile, 128), lambda rb: (rb, 0)),
                      pl.BlockSpec((row_tile, 128), lambda rb: (rb, 0))],
            out_specs=pl.BlockSpec((1, 4), lambda rb: (0, 0),
                                   memory_space=pltpu.MemorySpace.SMEM),
            scratch_shapes=[pltpu.VMEM((row_tile, 128), jnp.float32)] * 4),
        compiler_params=pltpu.CompilerParams(
            dimension_semantics=("arbitrary",),
            vmem_limit_bytes=_vmem_limit_bytes()),
    )(s2d, o2d)

    s_sum, s_cnt = sums[0, 0], sums[0, 1]
    o_sum, o_cnt = sums[0, 2], sums[0, 3]
    scale_reg = jnp.where(s_cnt > 0, s_sum / jnp.maximum(s_cnt, 1.0), 0.0)
    off_reg = jnp.where(o_cnt > 0, o_sum / jnp.maximum(o_cnt, 1.0), 0.0)
    return scale_reg, off_reg


# ----------------------------------------------------------------------------
# Trainer forward (JAX port of compute_flash3d_losses)
# ----------------------------------------------------------------------------
class _NS:
    def __init__(self, **kw):
        self.__dict__.update(kw)


def make_cfg():
    return _NS(
        task_name="flash3d",
        dataset=_NS(pad_border_aug=2),
        model=_NS(gaussian_rendering=True, predict_offset=True),
        loss=_NS(
            mse=_NS(weight=0.15, type="l1"),
            ssim=_NS(weight=0.85),
            lpips=_NS(weight=0.0, apply_after_step=0),
            gauss_scale=_NS(weight=0.1, thresh=0.1),
            gauss_offset=_NS(weight=0.1, thresh=0.05),
        ),
    )


def all_frame_ids(inputs):
    return sorted({k[1] for k in inputs.keys() if k[0] == "color_aug"})


def compute_flash3d_losses(cfg, inputs, outputs):
    losses = {}
    total_loss = 0.0
    if cfg.model.gaussian_rendering:
        big_g_lmbd = cfg.loss.gauss_scale.weight
        offs_lmbd = cfg.loss.gauss_offset.weight
        need_offset = cfg.model.predict_offset and offs_lmbd > 0
        if big_g_lmbd > 0 or need_offset:
            scale_reg, off_reg = gauss_reg_losses(
                outputs["gauss_scaling"], outputs["gauss_offset"],
                cfg.loss.gauss_scale.thresh, cfg.loss.gauss_offset.thresh)
            if big_g_lmbd > 0:
                losses["loss/big_gauss_reg_loss"] = scale_reg
                total_loss = total_loss + big_g_lmbd * scale_reg
            if need_offset:
                losses["loss/gauss_offset_reg"] = off_reg
                total_loss = total_loss + offs_lmbd * off_reg

        frame_ids = all_frame_ids(inputs)[:3]
        p = cfg.dataset.pad_border_aug
        preds, targets = [], []
        for frame_id in frame_ids:
            target = inputs[("color_aug", frame_id, 0)]
            target = target[:, :, p:target.shape[2] - p, p:target.shape[3] - p]
            targets.append(target)
            preds.append(outputs[("color_gauss", frame_id, 0)])

        mse_means, ssim_means = recon_loss_terms_all_frames(
            preds, targets, cfg.loss.mse.type)

        rec_loss = 0.0
        for idx, _frame_id in enumerate(frame_ids):
            frame_rec = 0.0
            if cfg.loss.mse.weight > 0:
                losses["loss/mse"] = mse_means[idx]  # torch overwrites per frame
                frame_rec = frame_rec + cfg.loss.mse.weight * mse_means[idx]
            if cfg.loss.ssim.weight > 0:
                losses["loss/ssim"] = ssim_means[idx]
                frame_rec = frame_rec + cfg.loss.ssim.weight * ssim_means[idx]
            # TODO(synk): LPIPS (pretrained VGG perceptual net) has no in-script
            # Pallas equivalent; cfg.loss.lpips.weight is 0 so the branch is inactive.
            rec_loss = rec_loss + frame_rec
        rec_loss = rec_loss / len(frame_ids)
        losses["loss/rec"] = rec_loss
        total_loss = total_loss + rec_loss

    if outputs["error"]:
        total_loss = total_loss - total_loss
    losses["loss/total"] = total_loss
    return losses


def trainer_forward(cfg, inputs, outputs):
    # outputs = self.model.forward(inputs) happens upstream (synthetic here).
    losses = compute_flash3d_losses(cfg, inputs, outputs)
    # get_grad_norm: forward-only run -> no .grad populated -> 0.0 (as in torch).
    outputs["grad_norm"] = 0.0
    return losses, outputs


def synthetic_model_forward(cfg, inputs, key):
    # TODO(synk): GaussianPredictor / GATModel backbones are external modules not
    # defined in trainer.py; their outputs are generated deterministically here.
    outputs = {}
    frame_ids = all_frame_ids(inputs)
    p = cfg.dataset.pad_border_aug
    for frame_id in frame_ids:
        key, k = jax.random.split(key)
        t = inputs[("color_aug", frame_id, 0)]
        B, C, Hp, Wp = t.shape
        H, W = Hp - 2 * p, Wp - 2 * p
        outputs[("color_gauss", frame_id, 0)] = jax.random.uniform(
            k, (B, C, H, W), jnp.float32)
    key, k1, k2 = jax.random.split(key, 3)
    B = inputs[("color_aug", frame_ids[0], 0)].shape[0]
    outputs["gauss_scaling"] = jax.random.uniform(k1, (B, 3, 16, 16), jnp.float32) * 0.3
    outputs["gauss_offset"] = jax.random.normal(k2, (B, 3, 16, 16), jnp.float32) * 0.1
    outputs["error"] = False
    return outputs


# ----------------------------------------------------------------------------
# Plain-JAX reference (for correctness check only)
# ----------------------------------------------------------------------------
def _ref_recon(pred, target, mse_type):
    xp = jnp.pad(pred, ((0, 0), (0, 0), (1, 1), (1, 1)), mode="reflect")
    yp = jnp.pad(target, ((0, 0), (0, 0), (1, 1), (1, 1)), mode="reflect")
    H, W = pred.shape[2], pred.shape[3]

    def pool3(a):
        s = jnp.zeros_like(pred)
        for dy in range(3):
            for dx in range(3):
                s = s + a[:, :, dy:dy + H, dx:dx + W]
        return s / 9.0

    mu_x, mu_y = pool3(xp), pool3(yp)
    sx = pool3(xp * xp) - mu_x ** 2
    sy = pool3(yp * yp) - mu_y ** 2
    sxy = pool3(xp * yp) - mu_x * mu_y
    n = (2 * mu_x * mu_y + _C1) * (2 * sxy + _C2)
    d = (mu_x ** 2 + mu_y ** 2 + _C1) * (sx + sy + _C2)
    ssim = jnp.mean(jnp.clip((1 - n / d) / 2, 0, 1))
    diff = pred - target
    mse = jnp.mean(jnp.abs(diff)) if mse_type == "l1" else jnp.mean(diff ** 2)
    return mse, ssim


def _ref_total(cfg, inputs, outputs):
    total = 0.0
    sc = outputs["gauss_scaling"]
    m = sc > cfg.loss.gauss_scale.thresh
    total += cfg.loss.gauss_scale.weight * jnp.where(
        m.sum() > 0, jnp.sum(jnp.where(m, sc, 0.0)) / jnp.maximum(m.sum(), 1), 0.0)
    off2 = outputs["gauss_offset"] ** 2
    m2 = off2 > cfg.loss.gauss_offset.thresh ** 2
    total += cfg.loss.gauss_offset.weight * jnp.where(
        m2.sum() > 0, jnp.sum(jnp.where(m2, off2, 0.0)) / jnp.maximum(m2.sum(), 1), 0.0)
    p = cfg.dataset.pad_border_aug
    rec = 0.0
    fids = all_frame_ids(inputs)[:3]
    for fid in fids:
        tgt = inputs[("color_aug", fid, 0)][:, :, p:-p, p:-p]
        prd = outputs[("color_gauss", fid, 0)]
        mse, ssim = _ref_recon(prd, tgt, cfg.loss.mse.type)
        rec = rec + cfg.loss.mse.weight * mse + cfg.loss.ssim.weight * ssim
    return total + rec / len(fids)


# ----------------------------------------------------------------------------
if __name__ == "__main__":
    cfg = make_cfg()
    key = jax.random.PRNGKey(0)

    B, C, H, W = 2, 3, 16, 16
    p = cfg.dataset.pad_border_aug
    inputs = {}
    for fid in (0, 1, 2):
        key, k = jax.random.split(key)
        inputs[("color_aug", fid, 0)] = jax.random.uniform(
            k, (B, C, H + 2 * p, W + 2 * p), jnp.float32)

    key, km = jax.random.split(key)
    outputs = synthetic_model_forward(cfg, inputs, km)

    losses, outputs = trainer_forward(cfg, inputs, outputs)
    total = jax.block_until_ready(losses["loss/total"])

    # Correctness check against plain-JAX reference (approx reciprocal in the
    # SSIM kernel contributes < ~2e-3 relative error to the ssim term).
    ref = jax.block_until_ready(_ref_total(cfg, inputs, outputs))
    assert jnp.allclose(total, ref, rtol=5e-3, atol=5e-3), (float(total), float(ref))
    assert bool(jnp.isfinite(total))

    print("KERNEL_OK")
</pallas_src>

<mosaic_0001>
module attributes {stable_mosaic.version = 11 : i64} {
  func.func @_gauss_reg_kernel(%arg0: i32, %arg1: memref<16x128xf32, #tpu.memory_space<vmem>>, %arg2: memref<16x128xf32, #tpu.memory_space<vmem>>, %arg3: memref<1x4xf32, #tpu.memory_space<smem>>, %arg4: memref<16x128xf32, #tpu.memory_space<vmem>>, %arg5: memref<16x128xf32, #tpu.memory_space<vmem>>, %arg6: memref<16x128xf32, #tpu.memory_space<vmem>>, %arg7: memref<16x128xf32, #tpu.memory_space<vmem>>) attributes {dimension_semantics = [#tpu.dimension_semantics<arbitrary>], iteration_bounds = array<i64: 1>, scalar_prefetch = 0 : i64, scratch_operands = 4 : i64, tpu.core_type = #tpu.core_type<tc>, window_params = [{transform_indices = @transform_0, window_bounds = array<i64: 16, 128>}, {transform_indices = @transform_1, window_bounds = array<i64: 16, 128>}, {transform_indices = @transform_2, window_bounds = array<i64: 1, 4>}]} {
    %c0_i32 = arith.constant 0 : i32
    %0 = arith.cmpi eq, %arg0, %c0_i32 : i32
    %1 = arith.extui %0 : i1 to i32
    %c0_i32_0 = arith.constant 0 : i32
    %2 = arith.cmpi ne, %1, %c0_i32_0 : i32
    scf.if %2 {
      %cst_23 = arith.constant 0.000000e+00 : f32
      %31 = vector.broadcast %cst_23 : f32 to vector<16x128xf32>
      %c0_24 = arith.constant 0 : index
      %c0_25 = arith.constant 0 : index
      %32 = vector.load %arg4[%c0_24, %c0_25] : memref<16x128xf32, #tpu.memory_space<vmem>>, vector<16x128xf32>
      tpu.vector_store %arg4[%c0_24, %c0_25], %31 {strides = array<i32>} : memref<16x128xf32, #tpu.memory_space<vmem>>, vector<16x128xf32>,
      %cst_26 = arith.constant 0.000000e+00 : f32
      %33 = vector.broadcast %cst_26 : f32 to vector<16x128xf32>
      %c0_27 = arith.constant 0 : index
      %c0_28 = arith.constant 0 : index
      %34 = vector.load %arg5[%c0_27, %c0_28] : memref<16x128xf32, #tpu.memory_space<vmem>>, vector<16x128xf32>
      tpu.vector_store %arg5[%c0_27, %c0_28], %33 {strides = array<i32>} : memref<16x128xf32, #tpu.memory_space<vmem>>, vector<16x128xf32>,
      %cst_29 = arith.constant 0.000000e+00 : f32
      %35 = vector.broadcast %cst_29 : f32 to vector<16x128xf32>
      %c0_30 = arith.constant 0 : index
      %c0_31 = arith.constant 0 : index
      %36 = vector.load %arg6[%c0_30, %c0_31] : memref<16x128xf32, #tpu.memory_space<vmem>>, vector<16x128xf32>
      tpu.vector_store %arg6[%c0_30, %c0_31], %35 {strides = array<i32>} : memref<16x128xf32, #tpu.memory_space<vmem>>, vector<16x128xf32>,
      %cst_32 = arith.constant 0.000000e+00 : f32
      %37 = vector.broadcast %cst_32 : f32 to vector<16x128xf32>
      %c0_33 = arith.constant 0 : index
      %c0_34 = arith.constant 0 : index
      %38 = vector.load %arg7[%c0_33, %c0_34] : memref<16x128xf32, #tpu.memory_space<vmem>>, vector<16x128xf32>
      tpu.vector_store %arg7[%c0_33, %c0_34], %37 {strides = array<i32>} : memref<16x128xf32, #tpu.memory_space<vmem>>, vector<16x128xf32>,
    } else {
    }
    %c0 = arith.constant 0 : index
    %c0_1 = arith.constant 0 : index
    %3 = vector.load %arg1[%c0, %c0_1] : memref<16x128xf32, #tpu.memory_space<vmem>>, vector<16x128xf32>
    %c0_2 = arith.constant 0 : index
    %c0_3 = arith.constant 0 : index
    %4 = vector.load %arg2[%c0_2, %c0_3] : memref<16x128xf32, #tpu.memory_space<vmem>>, vector<16x128xf32>
    %cst = arith.constant 1.000000e-01 : f32
    %5 = vector.broadcast %cst : f32 to vector<16x128xf32>
    %6 = arith.cmpf ogt, %3, %5 : vector<16x128xf32>
    %7 = arith.extui %6 : vector<16x128xi1> to vector<16x128xi32>
    %8 = arith.sitofp %7 : vector<16x128xi32> to vector<16x128xf32>
    %9 = arith.mulf %4, %4 : vector<16x128xf32>
    %cst_4 = arith.constant 2.500000e-03 : f32
    %10 = vector.broadcast %cst_4 : f32 to vector<16x128xf32>
    %11 = arith.cmpf ogt, %9, %10 : vector<16x128xf32>
    %12 = arith.extui %11 : vector<16x128xi1> to vector<16x128xi32>
    %13 = arith.sitofp %12 : vector<16x128xi32> to vector<16x128xf32>
    %c0_5 = arith.constant 0 : index
    %c0_6 = arith.constant 0 : index
    %14 = vector.load %arg4[%c0_5, %c0_6] : memref<16x128xf32, #tpu.memory_space<vmem>>, vector<16x128xf32>
    %15 = arith.mulf %3, %8 : vector<16x128xf32>
    %16 = arith.addf %14, %15 : vector<16x128xf32>
    %c0_7 = arith.constant 0 : index
    %c0_8 = arith.constant 0 : index
    %17 = vector.load %arg4[%c0_7, %c0_8] : memref<16x128xf32, #tpu.memory_space<vmem>>, vector<16x128xf32>
    tpu.vector_store %arg4[%c0_7, %c0_8], %16 {strides = array<i32>} : memref<16x128xf32, #tpu.memory_space<vmem>>, vector<16x128xf32>,
    %c0_9 = arith.constant 0 : index
    %c0_10 = arith.constant 0 : index
    %18 = vector.load %arg5[%c0_9, %c0_10] : memref<16x128xf32, #tpu.memory_space<vmem>>, vector<16x128xf32>
    %19 = arith.addf %18, %8 : vector<16x128xf32>
    %c0_11 = arith.constant 0 : index
    %c0_12 = arith.constant 0 : index
    %20 = vector.load %arg5[%c0_11, %c0_12] : memref<16x128xf32, #tpu.memory_space<vmem>>, vector<16x128xf32>
    tpu.vector_store %arg5[%c0_11, %c0_12], %19 {strides = array<i32>} : memref<16x128xf32, #tpu.memory_space<vmem>>, vector<16x128xf32>,
    %c0_13 = arith.constant 0 : index
    %c0_14 = arith.constant 0 : index
    %21 = vector.load %arg6[%c0_13, %c0_14] : memref<16x128xf32, #tpu.memory_space<vmem>>, vector<16x128xf32>
    %22 = arith.mulf %9, %13 : vector<16x128xf32>
    %23 = arith.addf %21, %22 : vector<16x128xf32>
    %c0_15 = arith.constant 0 : index
    %c0_16 = arith.constant 0 : index
    %24 = vector.load %arg6[%c0_15, %c0_16] : memref<16x128xf32, #tpu.memory_space<vmem>>, vector<16x128xf32>
    tpu.vector_store %arg6[%c0_15, %c0_16], %23 {strides = array<i32>} : memref<16x128xf32, #tpu.memory_space<vmem>>, vector<16x128xf32>,
    %c0_17 = arith.constant 0 : index
    %c0_18 = arith.constant 0 : index
    %25 = vector.load %arg7[%c0_17, %c0_18] : memref<16x128xf32, #tpu.memory_space<vmem>>, vector<16x128xf32>
    %26 = arith.addf %25, %13 : vector<16x128xf32>
    %c0_19 = arith.constant 0 : index
    %c0_20 = arith.constant 0 : index
    %27 = vector.load %arg7[%c0_19, %c0_20] : memref<16x128xf32, #tpu.memory_space<vmem>>, vector<16x128xf32>
    tpu.vector_store %arg7[%c0_19, %c0_20], %26 {strides = array<i32>} : memref<16x128xf32, #tpu.memory_space<vmem>>, vector<16x128xf32>,
    %c0_i32_21 = arith.constant 0 : i32
    %28 = arith.cmpi eq, %arg0, %c0_i32_21 : i32
    %29 = arith.extui %28 : i1 to i32
    %c0_i32_22 = arith.constant 0 : i32
    %30 = arith.cmpi ne, %29, %c0_i32_22 : i32
    scf.if %30 {
      %c0_23 = arith.constant 0 : index
      %c0_24 = arith.constant 0 : index
      %31 = vector.load %arg4[%c0_23, %c0_24] : memref<16x128xf32, #tpu.memory_space<vmem>>, vector<16x128xf32>
      %32 = vector.shape_cast %31 : vector<16x128xf32> to vector<1x16x128xf32>
      %cst_25 = arith.constant dense<0.000000e+00> : vector<1xf32>
      %33 = vector.multi_reduction <add>, %32, %cst_25 [1, 2] : vector<1x16x128xf32> to vector<1xf32>
      %34 = vector.shape_cast %33 : vector<1xf32> to vector<1x1x1xf32>
      %35 = vector.extract %34[0, 0, 0] : f32 from vector<1x1x1xf32>
      %c0_26 = arith.constant 0 : index
      %c0_27 = arith.constant 0 : index
      %36 = memref.load %arg3[%c0_26, %c0_27] : memref<1x4xf32, #tpu.memory_space<smem>>
      memref.store %35, %arg3[%c0_26, %c0_27] : memref<1x4xf32, #tpu.memory_space<smem>>
      %c0_28 = arith.constant 0 : index
      %c0_29 = arith.constant 0 : index
      %37 = vector.load %arg5[%c0_28, %c0_29] : memref<16x128xf32, #tpu.memory_space<vmem>>, vector<16x128xf32>
      %38 = vector.shape_cast %37 : vector<16x128xf32> to vector<1x16x128xf32>
      %cst_30 = arith.constant dense<0.000000e+00> : vector<1xf32>
      %39 = vector.multi_reduction <add>, %38, %cst_30 [1, 2] : vector<1x16x128xf32> to vector<1xf32>
      %40 = vector.shape_cast %39 : vector<1xf32> to vector<1x1x1xf32>
      %41 = vector.extract %40[0, 0, 0] : f32 from vector<1x1x1xf32>
      %c0_31 = arith.constant 0 : index
      %c1 = arith.constant 1 : index
      %42 = memref.load %arg3[%c0_31, %c1] : memref<1x4xf32, #tpu.memory_space<smem>>
      memref.store %41, %arg3[%c0_31, %c1] : memref<1x4xf32, #tpu.memory_space<smem>>
      %c0_32 = arith.constant 0 : index
      %c0_33 = arith.constant 0 : index
      %43 = vector.load %arg6[%c0_32, %c0_33] : memref<16x128xf32, #tpu.memory_space<vmem>>, vector<16x128xf32>
      %44 = vector.shape_cast %43 : vector<16x128xf32> to vector<1x16x128xf32>
      %cst_34 = arith.constant dense<0.000000e+00> : vector<1xf32>
      %45 = vector.multi_reduction <add>, %44, %cst_34 [1, 2] : vector<1x16x128xf32> to vector<1xf32>
      %46 = vector.shape_cast %45 : vector<1xf32> to vector<1x1x1xf32>
      %47 = vector.extract %46[0, 0, 0] : f32 from vector<1x1x1xf32>
      %c0_35 = arith.constant 0 : index
      %c2 = arith.constant 2 : index
      %48 = memref.load %arg3[%c0_35, %c2] : memref<1x4xf32, #tpu.memory_space<smem>>
      memref.store %47, %arg3[%c0_35, %c2] : memref<1x4xf32, #tpu.memory_space<smem>>
      %c0_36 = arith.constant 0 : index
      %c0_37 = arith.constant 0 : index
      %49 = vector.load %arg7[%c0_36, %c0_37] : memref<16x128xf32, #tpu.memory_space<vmem>>, vector<16x128xf32>
      %50 = vector.shape_cast %49 : vector<16x128xf32> to vector<1x16x128xf32>
      %cst_38 = arith.constant dense<0.000000e+00> : vector<1xf32>
      %51 = vector.multi_reduction <add>, %50, %cst_38 [1, 2] : vector<1x16x128xf32> to vector<1xf32>
      %52 = vector.shape_cast %51 : vector<1xf32> to vector<1x1x1xf32>
      %53 = vector.extract %52[0, 0, 0] : f32 from vector<1x1x1xf32>
      %c0_39 = arith.constant 0 : index
      %c3 = arith.constant 3 : index
      %54 = memref.load %arg3[%c0_39, %c3] : memref<1x4xf32, #tpu.memory_space<smem>>
      memref.store %53, %arg3[%c0_39, %c3] : memref<1x4xf32, #tpu.memory_space<smem>>
    } else {
    }
    return
  }
  func.func @transform_0(%arg0: i32) -> (i32, i32) {
    %c0_i32 = arith.constant 0 : i32
    %c0_i32_0 = arith.constant 0 : i32
    return %arg0, %c0_i32 : i32, i32
  }
  func.func @transform_1(%arg0: i32) -> (i32, i32) {
    %c0_i32 = arith.constant 0 : i32
    %c0_i32_0 = arith.constant 0 : i32
    return %arg0, %c0_i32 : i32, i32
  }
  func.func @transform_2(%arg0: i32) -> (i32, i32) {
    %c0_i32 = arith.constant 0 : i32
    %c0_i32_0 = arith.constant 0 : i32
    %c0_i32_1 = arith.constant 0 : i32
    return %c0_i32, %c0_i32_0 : i32, i32
  }
}

</mosaic_0001>

<bundles_post_ra>
// kernel: tpu_custom_call.1
= control target key start
LH: loop header
LB: loop body
LE: loop exit
PB: predicated region body
PF: predicated region fallthrough
CT: control target
= control target key end

     0   :  { %7 = vsyncpa [#allocation7], 0  ;;  %s307_s0 = inlined_call_operand.hbm [shape: f32[16,128], index: 0, kind: input, shape index: {}]   ;;  %s308_s1 = inlined_call_operand.hbm [shape: f32[16,128], index: 1, kind: input, shape index: {}]   ;;  %s309_s2 = inlined_call_operand.hbm [shape: f32[1,4], index: 2, kind: output, shape index: {}]  }
   0x1   :  { %8 = vsyncpa [#allocation10], 0 }
   0x2   :  { %9 = vsyncpa [#allocation8], 0  ;;  %s250_s9 = smov [#allocation6]   ;;  %s190_s13 = scalar_lea.hbm %s307_s0, 256 }
   0x3   :  { %s15_s10 = sshll.u32 %s250_s9, 4  ;;  %p191_p0 = scmp.ne.s32.totalorder %s307_s0, %s190_s13  ;;  %s16_s10 = int_to_ptr.vmem [resolvable:$true] %s15_s10 }
   0x4   :  { %p194_p1 = scmp.lt.u32.totalorder %s190_s13, %s307_s0 }
   0x6   :  { %p196_p2 = pnand %p194_p1, %p191_p0 }
   0x8   :  { %199 = shalt.err (!%p196_p2)
}
   0x9   :  { %s200_s18 = scalar_lea.vmem %s16_s10, 256  ;;  %p205_p4 = scmp.lt.s32.totalorder %s16_s10, %s16_s10 }
   0xa   :  { %p201_p3 = scmp.ne.s32.totalorder %s16_s10, %s200_s18  ;;  %p206_p5 = scmp.lt.s32.totalorder %s200_s18, %s200_s18 }
   0xc   :  { %p207_p6 = por %p206_p5, %p205_p4 }
   0xe   :  { %p208_p7 = pnand %p207_p6, %p201_p3 }
  0x10   :  { %211 = shalt.err (!%p208_p7)
}
  0x11   :  { %s251_s19 = smov 128   ;;  %s252_s20 = smov 8  }
  0x12   :  { %21 = dma.hbm_to_vmem [thread:$0]  %s307_s0, 256, %s16_s10, [#allocation7], %s251_s19, %s251_s19, %s252_s20  }
  0x13   :  { %s253_s23 = smov [#allocation9]   ;;  %s212_s27 = scalar_lea.hbm %s308_s1, 256 }
  0x14   :  { %s27_s24 = sshll.u32 %s253_s23, 4  ;;  %p213_p8 = scmp.ne.s32.totalorder %s308_s1, %s212_s27  ;;  %s28_s24 = int_to_ptr.vmem [resolvable:$true] %s27_s24 }
  0x15   :  { %p216_p9 = scmp.lt.u32.totalorder %s212_s27, %s308_s1 }
  0x17   :  { %p218_p10 = pnand %p216_p9, %p213_p8 }
  0x19   :  { %221 = shalt.err (!%p218_p10)
}
  0x1a   :  { %s222_s4 = scalar_lea.vmem %s28_s24, 256  ;;  %p227_p12 = scmp.lt.s32.totalorder %s28_s24, %s28_s24 }
  0x1b   :  { %p223_p11 = scmp.ne.s32.totalorder %s28_s24, %s222_s4  ;;  %p228_p13 = scmp.lt.s32.totalorder %s222_s4, %s222_s4 }
  0x1d   :  { %p229_p0 = por %p228_p13, %p227_p12 }
  0x1f   :  { %p230_p1 = pnand %p229_p0, %p223_p11 }
  0x21   :  { %233 = shalt.err (!%p230_p1)
}
  0x22   :  { %33 = dma.hbm_to_vmem [thread:$0]  %s308_s1, 256, %s28_s24, [#allocation10], %s251_s19, %s251_s19, %s252_s20  }
  0x23   :  { %244 = dma.done.wait [#allocation7], 256  }
  0x24   :  { %245 = vsyncadd [#allocation7], 4294967040 }
  0x25   :  { %246 = dma.done.wait [#allocation10], 256  }
  0x26   :  { %247 = vsyncadd [#allocation10], 4294967040  ;;  %v52_v0 = vld [vmem:[#allocation6] sm:$0xff]  ;;  %v53_v1 = vld [vmem:[#allocation6 + $0x8] sm:$0xff]  ;;  %v254_v5 = vmov 0.0   ;;  %s234_s11 = scalar_lea.hbm %s309_s2, 16 }
  0x27   :  { %v54_v2 = vld [vmem:[#allocation9] sm:$0xff]  ;;  %vm56_vm0 = vcmp.gt.f32.partialorder %v52_v0, 0.1  ;;  %vm57_vm1 = vcmp.gt.f32.partialorder %v53_v1, 0.1  ;;  %v55_v3 = vld [vmem:[#allocation9 + $0x8] sm:$0xff]  ;;  %p235_p2 = scmp.ne.s32.totalorder %s309_s2, %s234_s11  ;;  %p238_p3 = scmp.lt.u32.totalorder %s234_s11, %s309_s2 }
  0x28   :  { %v62_v4 = vmul.f32 %v54_v2, %v54_v2  ;;  %v172_v6 = vsel %vm56_vm0, 1.0, %v254_v5  ;;  %v173_v7 = vsel %vm57_vm1, 1.0, %v254_v5  ;;  %v63_v8 = vmul.f32 %v55_v3, %v55_v3 }
  0x29   :  { %v72_v9 = vmul.f32 %v172_v6, %v52_v0  ;;  %v73_v10 = vmul.f32 %v173_v7, %v53_v1  ;;  %v117_v16 = vadd.f32 %v173_v7, %v172_v6  ;;  %p240_p4 = pnand %p238_p3, %p235_p2 }
  0x2a   :  { %vm64_vm2 = vcmp.gt.f32.partialorder %v62_v4, 0.0025  ;;  %vm65_vm3 = vcmp.gt.f32.partialorder %v63_v8, 0.0025 }
  0x2b   :  { %v174_v11 = vsel %vm64_vm2, 1.0, %v254_v5  ;;  %v103_v12 = vadd.f32 %v73_v10, %v72_v9  ;;  %v175_v13 = vsel %vm65_vm3, 1.0, %v254_v5 }
  0x2c   :  { %v86_v14 = vmul.f32 %v174_v11, %v62_v4  ;;  %v87_v15 = vmul.f32 %v175_v13, %v63_v8  ;;  %v145_v18 = vadd.f32 %v175_v13, %v174_v11 }
  0x2d   :  { %104 = vadd.xlane.f32.xlu0 %v103_v12 }
  0x2e   :  { %v131_v17 = vadd.f32 %v87_v15, %v86_v14 }
  0x30   :  { %132 = vadd.xlane.f32.xlu1 %v131_v17 }
  0x31   :  { %118 = vadd.xlane.f32.xlu0 %v117_v16 }
  0x34   :  { %146 = vadd.xlane.f32.xlu1 %v145_v18 }
  0xba   :  { %v105_v19 = vpop.xlane.xlu0 %104 }
  0xbb   :  { %v106_v20 = vrot.slane %v105_v19, 4 }
  0xbd   :  { %v107_v21 = vadd.f32 %v106_v20, %v105_v19  ;;  %v133_v22 = vpop.xlane.xlu1 %132 }
  0xbe   :  { %v134_v23 = vrot.slane %v133_v22, 4  ;;  %v119_v24 = vpop.xlane.xlu0 %118 }
  0xbf   :  { %v108_v25 = vrot.slane %v107_v21, 2  ;;  %v120_v26 = vrot.slane %v119_v24, 4 }
  0xc0   :  { %v135_v27 = vadd.f32 %v134_v23, %v133_v22 }
  0xc1   :  { %v121_v28 = vadd.f32 %v120_v26, %v119_v24  ;;  %v147_v29 = vpop.xlane.xlu1 %146  ;;  %v109_v30 = vadd.f32 %v108_v25, %v107_v21 }
  0xc2   :  { %v136_v31 = vrot.slane %v135_v27, 2  ;;  %v148_v32 = vrot.slane %v147_v29, 4 }
  0xc3   :  { %v122_v33 = vrot.slane %v121_v28, 2  ;;  %v110_v34 = vrot.slane %v109_v30, 1 }
  0xc4   :  { %v149_v35 = vadd.f32 %v148_v32, %v147_v29  ;;  %v137_v36 = vadd.f32 %v136_v31, %v135_v27 }
  0xc5   :  { %v123_v37 = vadd.f32 %v122_v33, %v121_v28  ;;  %v111_v38 = vadd.f32 %v110_v34, %v109_v30 }
  0xc6   :  { %v150_v39 = vrot.slane %v149_v35, 2  ;;  %v138_v40 = vrot.slane %v137_v36, 1 }
  0xc7   :  { %176 = vpush %v111_v38  ;;  %v124_v41 = vrot.slane %v123_v37, 1 }
  0xc8   :  { %v151_v42 = vadd.f32 %v150_v39, %v149_v35  ;;  %v139_v44 = vadd.f32 %v138_v40, %v137_v36 }
  0xc9   :  { %v125_v43 = vadd.f32 %v124_v41, %v123_v37 }
  0xca   :  { %v152_v45 = vrot.slane %v151_v42, 1 }
  0xcb   :  { %178 = vpush %v125_v43 }
  0xcc   :  { %180 = vpush %v139_v44  ;;  %v153_v46 = vadd.f32 %v152_v45, %v151_v42 }
  0xce   :  { %182 = vpush %v153_v46 }
  0xf8   :  { %s177_s1 = spop %176 }
  0xf9   :  { %114 = sst [smem:[#allocation11]] %s177_s1 }
  0xfc   :  { %s179_s6 = spop %178 }
  0xfd   :  { %128 = sst [smem:[#allocation11 + $0x1]] %s179_s6  ;;  %s181_s7 = spop %180 }
  0xfe   :  { %142 = sst [smem:[#allocation11 + $0x2]] %s181_s7 }
  0xff   :  { %s183_s8 = spop %182 }
 0x100   :  { %156 = sst [smem:[#allocation11 + $0x3]] %s183_s8 }
 0x101   :  { %243 = shalt.err (!%p240_p4)
}
 0x102   :  { %s255_s16 = smov [#allocation11]  }
 0x103   :  { %164 = dma.smem_to_hbm %s255_s16, 16, %s309_s2, [#allocation8]  }
 0x104   :  { %248 = dma.done.wait [#allocation8], 16  }
 0x105   :  { %249 = vsyncadd [#allocation8], 4294967280 }
 0x106   :  { %168 = sfence }
 0x107   :  { %169 = vsyncpa [#allocation7], 1 }
 0x108   :  { %170 = vsyncpa [#allocation10], 1 }
 0x109   :  { %171 = vsyncpa [#allocation8], 1 }

</bundles_post_ra>
